<compile_context>
chip_gen: v6e
topology: v6e:2x2x1
jax: 0.10.0
libtpu: 0.0.40
codegen_flags: <defaults>
</compile_context>

<pallas_src>
import jax
import jax.numpy as jnp
from jax.experimental import pallas as pl
from jax.experimental.pallas import tpu as pltpu

EPS = 1e-12  # matches F.normalize default eps


def _round_up(a, b):
    return (a + b - 1) // b * b


def _mm_body(x_ref, w_ref, xinv_ref, winv_ref, o_ref, acc_ref):
    """Shared body: K-resident f32 accumulation + normalized finalize."""
    k = pl.program_id(2)
    nk = pl.num_programs(2)

    @pl.when(k == 0)
    def _():
        acc_ref[...] = jnp.zeros_like(acc_ref)

    # MXU consumes the operands exactly as streamed from HBM (bf16 hot path),
    # accumulating in f32.  No per-tile casts in the body.
    acc_ref[...] += jnp.dot(x_ref[...], w_ref[...],
                            preferred_element_type=jnp.float32)

    @pl.when(k == nk - 1)
    def _():
        # Normalization = cheap (tm, tn) scaling by precomputed f32 inverse
        # row / column L2 norms (hoisted to the wrapper).
        o_ref[...] = (acc_ref[...] * xinv_ref[...] * winv_ref[...]
                      ).astype(o_ref.dtype)


def _kernel_acc_in_out(x_ref, w_ref, xinv_ref, winv_ref, o_ref):
    # f32 output: accumulate directly into the K-resident output block
    # (no separate acc scratch -> saves tm*tn*4 bytes of VMEM).
    _mm_body(x_ref, w_ref, xinv_ref, winv_ref, o_ref, o_ref)


def _kernel_acc_scratch(x_ref, w_ref, xinv_ref, winv_ref, o_ref, acc_ref):
    # Non-f32 output: f32 accumulator scratch, cast on finalize.
    _mm_body(x_ref, w_ref, xinv_ref, winv_ref, o_ref, acc_ref)


def _hw_defaults():
    """(tm, tn, tk, vmem_limit_bytes) tuned per TPU generation."""
    vmem_bytes = None
    try:
        vmem_bytes = getattr(pltpu.get_tpu_info(), "vmem_capacity_bytes", None)
    except Exception:
        pass
    if vmem_bytes is None:
        vmem_bytes = 64 * 1024 * 1024  # conservative (v7x-sized) fallback
    if vmem_bytes >= 100 * 1024 * 1024:
        # v5e / v6e: 128 MiB VMEM -> large output tiles toward the MXU roofline.
        return 1024, 1024, 512, 96 * 1024 * 1024
    # v7x: 64 MiB VMEM -> keep double-buffered footprint well under ~48 MiB.
    return 768, 1024, 1024, 48 * 1024 * 1024


def normed_linear(x, weight, *, mxu_dtype=jnp.bfloat16, out_dtype=None,
                  tm=None, tn=None, tk=None):
    """out = F.normalize(x, dim=1) @ F.normalize(weight, dim=0).

    x: (N, in_features), weight: (in_features, out_features).
    mxu_dtype=bfloat16 is the hot path (bf16 operands streamed from HBM, f32
    accumulation).  mxu_dtype=float32 is a debug / accuracy-check path only
    (several MXU passes per tile; especially slow on v5e).
    """
    n, in_f = x.shape
    in_f2, out_f = weight.shape
    assert in_f == in_f2, (x.shape, weight.shape)
    if out_dtype is None:
        out_dtype = x.dtype

    d_tm, d_tn, d_tk, vmem_limit = _hw_defaults()
    tm = d_tm if tm is None else tm
    tn = d_tn if tn is None else tn
    tk = d_tk if tk is None else tk

    # Sublane packing: bf16 operands need second-to-last block dims in
    # multiples of 16 (f32: 8); last dims in multiples of 128 (lane-dense).
    sub = 16 if jnp.dtype(mxu_dtype).itemsize == 2 else 8
    tm = _round_up(min(tm, _round_up(n, sub)), sub)
    tk = _round_up(min(tk, _round_up(in_f, 128)), 128)
    tn = _round_up(min(tn, _round_up(out_f, 128)), 128)

    mp = _round_up(n, tm)
    kp = _round_up(in_f, tk)
    np_ = _round_up(out_f, tn)

    # Inverse L2 norms in f32, hoisted out of the kernel.  Stays f32-accurate
    # even when the MXU operands are streamed as bf16.
    xf = x.astype(jnp.float32)
    x_inv = jax.lax.rsqrt(
        jnp.maximum(jnp.sum(xf * xf, axis=1, keepdims=True), EPS * EPS))
    wf = weight.astype(jnp.float32)
    w_inv = jax.lax.rsqrt(
        jnp.maximum(jnp.sum(wf * wf, axis=0, keepdims=True), EPS * EPS))

    # Cast operands straight to the MXU dtype (no f32 round-trip); pad only
    # when the problem is not already tile-aligned.
    # TODO(synk): for inference with a fixed weight, hoist w_op / w_inv prep
    # out of the per-call path and reuse across batches.
    x_op = x if x.dtype == jnp.dtype(mxu_dtype) else x.astype(mxu_dtype)
    w_op = weight if weight.dtype == jnp.dtype(mxu_dtype) else weight.astype(mxu_dtype)
    if (mp, kp) != (n, in_f):
        x_op = jnp.pad(x_op, ((0, mp - n), (0, kp - in_f)))
    if (kp, np_) != (in_f, out_f):
        w_op = jnp.pad(w_op, ((0, kp - in_f), (0, np_ - out_f)))
    if mp != n:
        x_inv = jnp.pad(x_inv, ((0, mp - n), (0, 0)))
    if np_ != out_f:
        w_inv = jnp.pad(w_inv, ((0, 0), (0, np_ - out_f)))

    grid = (mp // tm, np_ // tn, kp // tk)

    in_specs = [
        pl.BlockSpec((tm, tk), lambda i, j, k: (i, k)),   # x tile
        pl.BlockSpec((tk, tn), lambda i, j, k: (k, j)),   # w tile
        pl.BlockSpec((tm, 1), lambda i, j, k: (i, 0)),    # x row inverse norms
        pl.BlockSpec((1, tn), lambda i, j, k: (0, j)),    # w col inverse norms
    ]
    out_spec = pl.BlockSpec((tm, tn), lambda i, j, k: (i, j))

    if jnp.dtype(out_dtype) == jnp.dtype(jnp.float32):
        kernel = _kernel_acc_in_out
        scratch_shapes = []
    else:
        kernel = _kernel_acc_scratch
        scratch_shapes = [pltpu.VMEM((tm, tn), jnp.float32)]

    in_bytes = jnp.dtype(mxu_dtype).itemsize
    out_bytes = jnp.dtype(out_dtype).itemsize

    out_p = pl.pallas_call(
        kernel,
        out_shape=jax.ShapeDtypeStruct((mp, np_), out_dtype),
        grid_spec=pltpu.PrefetchScalarGridSpec(
            num_scalar_prefetch=0,
            grid=grid,
            in_specs=in_specs,
            out_specs=out_spec,
            scratch_shapes=scratch_shapes,
        ),
        compiler_params=pltpu.CompilerParams(
            # Row norms are precomputed, so M and N tiles are fully
            # independent -> both can shard across v7x's two TensorCores
            # (no-op on single-TC v5e/v6e); K is the reduction.
            dimension_semantics=("parallel", "parallel", "arbitrary"),
            vmem_limit_bytes=vmem_limit,
        ),
        cost_estimate=pl.CostEstimate(
            flops=2 * mp * kp * np_ + 3 * mp * np_,
            transcendentals=0,
            bytes_accessed=(
                (np_ // tn) * mp * kp * in_bytes      # x re-read per N tile
                + (mp // tm) * kp * np_ * in_bytes    # w re-read per M tile
                + mp * np_ * out_bytes                # output writeback
                + (mp + np_) * 4                      # inverse norms
            ),
        ),
    )(x_op, w_op, x_inv, w_inv)

    return out_p[:n, :out_f]


def init_normed_linear_weight(key, in_features, out_features):
    """Replicates: Tensor(in, out).uniform_(-1,1).renorm_(2, 1, 1e-5).mul_(1e5)
    -> renorm over dim=1 rescales each column w[:, j] to L2 norm 1e-5 (if it
    exceeded 1e-5), then *1e5 gives columns with norm ~= 1."""
    w = jax.random.uniform(
        key, (in_features, out_features), jnp.float32, minval=-1.0, maxval=1.0
    )
    col_norm = jnp.sqrt(jnp.sum(w * w, axis=0, keepdims=True))
    maxnorm = 1e-5
    scale = jnp.where(col_norm > maxnorm, maxnorm / (col_norm + 1e-7), 1.0)
    return w * scale * 1e5


def normed_linear_ref(x, weight):
    xn = x / jnp.maximum(jnp.linalg.norm(x, axis=1, keepdims=True), EPS)
    wn = weight / jnp.maximum(jnp.linalg.norm(weight, axis=0, keepdims=True), EPS)
    return xn @ wn


if __name__ == "__main__":
    key = jax.random.PRNGKey(0)
    kx, kw = jax.random.split(key)

    batch = 8
    in_features = 32
    out_features = 16

    x = jax.random.normal(kx, (batch, in_features), jnp.float32)
    w = init_normed_linear_weight(kw, in_features, out_features)

    ref = normed_linear_ref(x, w)

    # Hot path: bf16 operands streamed from HBM, f32 accumulation directly in
    # the K-resident output block (f32 output, no acc scratch).
    out_bf16 = jax.block_until_ready(normed_linear(x, w))
    assert out_bf16.shape == (batch, out_features)
    assert jnp.allclose(out_bf16, ref, atol=2e-2, rtol=2e-2)

    # bf16-output path (exercises the acc-scratch kernel variant; halves the
    # M*N writeback for mem-bound shapes).
    out_bf16o = jax.block_until_ready(
        normed_linear(x, w, out_dtype=jnp.bfloat16))
    assert out_bf16o.dtype == jnp.bfloat16
    assert jnp.allclose(out_bf16o.astype(jnp.float32), ref,
                        atol=3e-2, rtol=3e-2)

    # Debug / accuracy path: f32 MXU operands.
    out_f32 = jax.block_until_ready(
        normed_linear(x, w, mxu_dtype=jnp.float32))
    assert out_f32.shape == (batch, out_features)
    assert jnp.allclose(out_f32, ref, atol=1e-4, rtol=1e-4)

    print("KERNEL_OK")
</pallas_src>

<mosaic_0001>
module attributes {stable_mosaic.version = 11 : i64} {
  func.func @_kernel_acc_in_out(%arg0: i32, %arg1: i32, %arg2: i32, %arg3: memref<16x128xbf16, #tpu.memory_space<vmem>>, %arg4: memref<128x128xbf16, #tpu.memory_space<vmem>>, %arg5: memref<16x1xf32, #tpu.memory_space<vmem>>, %arg6: memref<1x128xf32, #tpu.memory_space<vmem>>, %arg7: memref<16x128xf32, #tpu.memory_space<vmem>>) attributes {dimension_semantics = [#tpu.dimension_semantics<parallel>, #tpu.dimension_semantics<parallel>, #tpu.dimension_semantics<arbitrary>], iteration_bounds = array<i64: 1, 1, 1>, scalar_prefetch = 0 : i64, scratch_operands = 0 : i64, tpu.core_type = #tpu.core_type<tc>, window_params = [{transform_indices = @transform_0, window_bounds = array<i64: 16, 128>}, {transform_indices = @transform_1, window_bounds = array<i64: 128, 128>}, {transform_indices = @transform_2, window_bounds = array<i64: 16, 1>}, {transform_indices = @transform_3, window_bounds = array<i64: 1, 128>}, {transform_indices = @transform_4, window_bounds = array<i64: 16, 128>}]} {
    %c0_i32 = arith.constant 0 : i32
    %0 = arith.cmpi eq, %arg2, %c0_i32 : i32
    %1 = arith.extui %0 : i1 to i32
    %c0_i32_0 = arith.constant 0 : i32
    %2 = arith.cmpi ne, %1, %c0_i32_0 : i32
    scf.if %2 {
      %cst_10 = arith.constant 0.000000e+00 : f32
      %12 = vector.broadcast %cst_10 : f32 to vector<16x128xf32>
      %c0_11 = arith.constant 0 : index
      %c0_12 = arith.constant 0 : index
      %13 = vector.load %arg7[%c0_11, %c0_12] : memref<16x128xf32, #tpu.memory_space<vmem>>, vector<16x128xf32>
      tpu.vector_store %arg7[%c0_11, %c0_12], %12 {strides = array<i32>} : memref<16x128xf32, #tpu.memory_space<vmem>>, vector<16x128xf32>,
    } else {
    }
    %c0 = arith.constant 0 : index
    %c0_1 = arith.constant 0 : index
    %3 = vector.load %arg7[%c0, %c0_1] : memref<16x128xf32, #tpu.memory_space<vmem>>, vector<16x128xf32>
    %c0_2 = arith.constant 0 : index
    %c0_3 = arith.constant 0 : index
    %4 = vector.load %arg3[%c0_2, %c0_3] : memref<16x128xbf16, #tpu.memory_space<vmem>>, vector<16x128xbf16>
    %c0_4 = arith.constant 0 : index
    %c0_5 = arith.constant 0 : index
    %5 = vector.load %arg4[%c0_4, %c0_5] : memref<128x128xbf16, #tpu.memory_space<vmem>>, vector<128x128xbf16>
    %cst = arith.constant dense<0.000000e+00> : vector<16x128xf32>
    %6 = tpu.matmul %4, %5, %cst {dimension_numbers = #tpu.dot_dimension_numbers<[1], [0], [0], [1], [0, 0, 1, 1], [], []>} : vector<16x128xbf16>, vector<128x128xbf16>, vector<16x128xf32> -> vector<16x128xf32>
    %7 = arith.addf %3, %6 : vector<16x128xf32>
    %c0_6 = arith.constant 0 : index
    %c0_7 = arith.constant 0 : index
    %8 = vector.load %arg7[%c0_6, %c0_7] : memref<16x128xf32, #tpu.memory_space<vmem>>, vector<16x128xf32>
    tpu.vector_store %arg7[%c0_6, %c0_7], %7 {strides = array<i32>} : memref<16x128xf32, #tpu.memory_space<vmem>>, vector<16x128xf32>,
    %c0_i32_8 = arith.constant 0 : i32
    %9 = arith.cmpi eq, %arg2, %c0_i32_8 : i32
    %10 = arith.extui %9 : i1 to i32
    %c0_i32_9 = arith.constant 0 : i32
    %11 = arith.cmpi ne, %10, %c0_i32_9 : i32
    scf.if %11 {
      %c0_10 = arith.constant 0 : index
      %c0_11 = arith.constant 0 : index
      %12 = vector.load %arg7[%c0_10, %c0_11] : memref<16x128xf32, #tpu.memory_space<vmem>>, vector<16x128xf32>
      %c0_12 = arith.constant 0 : index
      %c0_13 = arith.constant 0 : index
      %13 = vector.load %arg5[%c0_12, %c0_13] : memref<16x1xf32, #tpu.memory_space<vmem>>, vector<16x1xf32>
      %14 = vector.broadcast %13 : vector<16x1xf32> to vector<16x128xf32>
      %15 = arith.mulf %12, %14 : vector<16x128xf32>
      %c0_14 = arith.constant 0 : index
      %c0_15 = arith.constant 0 : index
      %16 = vector.load %arg6[%c0_14, %c0_15] : memref<1x128xf32, #tpu.memory_space<vmem>>, vector<1x128xf32>
      %17 = vector.broadcast %16 : vector<1x128xf32> to vector<16x128xf32>
      %18 = arith.mulf %15, %17 : vector<16x128xf32>
      %c0_16 = arith.constant 0 : index
      %c0_17 = arith.constant 0 : index
      %19 = vector.load %arg7[%c0_16, %c0_17] : memref<16x128xf32, #tpu.memory_space<vmem>>, vector<16x128xf32>
      tpu.vector_store %arg7[%c0_16, %c0_17], %18 {strides = array<i32>} : memref<16x128xf32, #tpu.memory_space<vmem>>, vector<16x128xf32>,
    } else {
    }
    return
  }
  func.func @transform_0(%arg0: i32, %arg1: i32, %arg2: i32) -> (i32, i32) {
    %c0_i32 = arith.constant 0 : i32
    return %arg0, %arg2 : i32, i32
  }
  func.func @transform_1(%arg0: i32, %arg1: i32, %arg2: i32) -> (i32, i32) {
    %c0_i32 = arith.constant 0 : i32
    return %arg2, %arg1 : i32, i32
  }
  func.func @transform_2(%arg0: i32, %arg1: i32, %arg2: i32) -> (i32, i32) {
    %c0_i32 = arith.constant 0 : i32
    %c0_i32_0 = arith.constant 0 : i32
    return %arg0, %c0_i32 : i32, i32
  }
  func.func @transform_3(%arg0: i32, %arg1: i32, %arg2: i32) -> (i32, i32) {
    %c0_i32 = arith.constant 0 : i32
    %c0_i32_0 = arith.constant 0 : i32
    return %c0_i32, %arg1 : i32, i32
  }
  func.func @transform_4(%arg0: i32, %arg1: i32, %arg2: i32) -> (i32, i32) {
    %c0_i32 = arith.constant 0 : i32
    return %arg0, %arg1 : i32, i32
  }
}

</mosaic_0001>

<bundles_post_ra>
// kernel: tpu_custom_call.1
= control target key start
LH: loop header
LB: loop body
LE: loop exit
PB: predicated region body
PF: predicated region fallthrough
CT: control target
= control target key end

     0   :  { %9 = vsyncpa [#allocation3], 0  ;;  %s359_s0 = inlined_call_operand.vmem [shape: bf16[16,128], index: 0, kind: input, shape index: {}]   ;;  %s360_s1 = inlined_call_operand.hbm [shape: bf16[128,128], index: 1, kind: input, shape index: {}]   ;;  %s361_s2 = inlined_call_operand.vmem [shape: f32[16,1], index: 2, kind: input, shape index: {}]   ;;  %s362_s3 = inlined_call_operand.vmem [shape: f32[1,128], index: 3, kind: input, shape index: {}]   ;;  %s363_s4 = inlined_call_operand.hbm [shape: f32[16,128], index: 4, kind: output, shape index: {}]  }
   0x1   :  { %10 = vsyncpa [#allocation4], 0  ;;  %s307_s15 = smov [#allocation2]  }
   0x2   :  { %s18_s16 = sshll.u32 %s307_s15, 4  ;;  %s19_s16 = int_to_ptr.vmem [resolvable:$true] %s18_s16 }
   0x3   :  { %s271_s17 = scalar_lea.vmem %s19_s16, 1024  ;;  %p276_p1 = scmp.lt.s32.totalorder %s19_s16, %s19_s16 }
   0x4   :  { %p272_p0 = scmp.ne.s32.totalorder %s19_s16, %s271_s17  ;;  %p277_p2 = scmp.lt.s32.totalorder %s271_s17, %s271_s17 }
   0x6   :  { %p278_p3 = por %p277_p2, %p276_p1 }
   0x8   :  { %p279_p4 = pnand %p278_p3, %p272_p0 }
   0xa   :  { %282 = shalt.err (!%p279_p4)
}
   0xb   :  { %s308_s18 = smov 64   ;;  %s309_s19 = smov 4  }
   0xc   :  { %24 = dma.hbm_to_vmem [thread:$0]  %s360_s1, 1024, %s19_s16, [#allocation3], %s308_s18, %s308_s18, %s309_s19  }
   0xd   :  { %303 = dma.done.wait [#allocation3], 1024  }
   0xe   :  { %304 = vsyncadd [#allocation3], 4294966272  ;;  %v310_v0 = vmov 0.0   ;;  %vm311_vm0 = vmmov 0   ;;  %v312_v1 = vmov 0   ;;  %v254_v2 = vld [vmem:[#allocation2 + $0x38] sm:$0xff]  }
   0xf   :  { %224 = vmatprep.subr.bf16.mxu0 %v310_v0  ;;  %240 = vmatprep.mubr.msk.bf16.mxu0 %vm311_vm0, %v310_v0  ;;  %v255_v3 = vld [vmem:[#allocation2 + $0x30] sm:$0xff]   ;;  %v256_v4 = vld [vmem:[#allocation2 + $0x28] sm:$0xff]   ;;  %v163_v5 = vld [vmem:[%s361_s2] sm:$0xff]  ;;  %s313_s28 = smov [#allocation5]  }
  0x10   :  { %253 = vset.pattern.permute.xlu0 %v312_v1  ;;  %225 = vmatpush3.bf16.msra.mxu0 %v254_v2  ;;  %v257_v6 = vld [vmem:[#allocation2 + $0x20] sm:$0xff]   ;;  %v164_v7 = vld [vmem:[%s361_s2 + $0x8] sm:$0xff]  ;;  %v258_v8 = vld [vmem:[#allocation2 + $0x18] sm:$0xff]   ;;  %s193_s29 = sshll.u32 %s313_s28, 4  ;;  %s194_s29 = int_to_ptr.vmem [resolvable:$true] %s193_s29 }
  0x11   :  { %226 = vmatprep.subr.bf16.mxu0 %v310_v0  ;;  %167 = vperm.xlu0 %253, %v163_v5   ;;  %v259_v9 = vld [vmem:[#allocation2 + $0x10] sm:$0xff]   ;;  %v260_v10 = vld [vmem:[#allocation2 + $0x8] sm:$0xff]   ;;  %v261_v11 = vld [vmem:[#allocation2] sm:$0xff]   ;;  %p288_p6 = scmp.lt.s32.totalorder %s194_s29, %s194_s29 }
  0x12   :  { %v262_v12 = vld [vmem:[%s359_s0] sm:$0xff]   ;;  %s283_s0 = scalar_lea.vmem %s194_s29, 256 }
  0x13   :  { %v214_v16 = vld [vmem:[%s362_s3] ss:$0 sm:$0xff]  ;;  %p284_p5 = scmp.ne.s32.totalorder %s194_s29, %s283_s0  ;;  %p289_p7 = scmp.lt.s32.totalorder %s283_s0, %s283_s0 }
  0x14   :  { %227 = vmatpush3.bf16.msra.mxu0 %v255_v3 }
  0x15   :  { %228 = vmatprep.subr.bf16.mxu0 %v310_v0  ;;  %172 = vperm.xlu0 %253, %v164_v7   ;;  %p290_p8 = por %p289_p7, %p288_p6 }
  0x17   :  { %p291_p9 = pnand %p290_p8, %p284_p5 }
  0x18   :  { %229 = vmatpush3.bf16.msra.mxu0 %v256_v4 }
  0x19   :  { %230 = vmatprep.subr.bf16.mxu0 %v310_v0 }
  0x1c   :  { %231 = vmatpush3.bf16.msra.mxu0 %v257_v6 }
  0x1d   :  { %232 = vmatprep.subr.bf16.mxu0 %v310_v0 }
  0x20   :  { %233 = vmatpush3.bf16.msra.mxu0 %v258_v8 }
  0x21   :  { %234 = vmatprep.subr.bf16.mxu0 %v310_v0 }
  0x24   :  { %235 = vmatpush3.bf16.msra.mxu0 %v259_v9 }
  0x25   :  { %236 = vmatprep.subr.bf16.mxu0 %v310_v0 }
  0x28   :  { %237 = vmatpush3.bf16.msra.mxu0 %v260_v10 }
  0x29   :  { %238 = vmatprep.subr.bf16.mxu0 %v310_v0 }
  0x2c   :  { %239 = vmatpush3.bf16.msra.mxu0 %v261_v11 }
  0x2f   :  { %241 = vmatmul.mubr.bf16.vlgmr.msra.gmra.mxu0 %v262_v12 }
  0x8c   :  { %v168_v14 = vpop.permute.xlu0 %167 }
  0x90   :  { %v173_v21 = vpop.permute.xlu0 %172 }
  0xef   :  { %v147_v13 = vpop.f32.mrf.mxu0 }
  0xf0   :  { %v175_v17 = vmul.f32 %v168_v14, %v147_v13 }
  0xf1   :  { %v242_v15 = vpop.f32.mrf.mxu0 }
  0xf2   :  { %v184_v19 = vmul.f32 %v214_v16, %v175_v17 }
  0xf3   :  { %v150_v18 = vpop.f32.mrf.mxu0 }
  0xf4   :  { %186 = vst [vmem:[#allocation5] sm:$0xff] %v184_v19  ;;  %v176_v22 = vmul.f32 %v173_v21, %v150_v18 }
  0xf5   :  { %v243_v20 = vpop.f32.mrf.mxu0 }
  0xf6   :  { %v185_v23 = vmul.f32 %v214_v16, %v176_v22 }
  0xf8   :  { %187 = vst [vmem:[#allocation5 + $0x8] sm:$0xff] %v185_v23 }
  0xf9   :  { %294 = shalt.err (!%p291_p9)
}
  0xfa   :  { %s314_s3 = smov 128   ;;  %s315_s30 = smov 8  }
  0xfb   :  { %199 = dma.vmem_to_hbm [thread:$0]  %s194_s29, 256, %s363_s4, [#allocation4], %s314_s3, %s314_s3, %s315_s30  }
  0xfc   :  { %305 = dma.done.wait [#allocation4], 256  }
  0xfd   :  { %306 = vsyncadd [#allocation4], 4294967040 }
  0xfe   :  { %203 = vsyncpa [#allocation3], 1 }
  0xff   :  { %204 = vsyncpa [#allocation4], 1 }

</bundles_post_ra>
